<compile_context>
chip_gen: v5e
topology: v5e:2x2
jax: 0.10.0
libtpu: 0.0.40
codegen_flags: <defaults>
</compile_context>

<pallas_src>
import functools

import jax
import jax.numpy as jnp
import numpy as np
from jax.experimental import pallas as pl
from jax.experimental.pallas import tpu as pltpu


def _round_up(x, m):
    return (x + m - 1) // m * m


def _prenorm_ln_kernel(x_ref, g_ref, b_ref, o_ref, *, eps):
    """Channel-wise LayerNorm on one (Bb, C, T) tile (C on sublanes, T on lanes)."""
    x = x_ref[...].astype(jnp.float32)                       # (Bb, C, T)
    mean = jnp.mean(x, axis=1, keepdims=True)                # (Bb, 1, T)
    cen = x - mean
    var = jnp.mean(cen * cen, axis=1, keepdims=True)         # unbiased=False
    # Matches torch exactly: (x - mean) / (sqrt(var) + eps).  approx=False keeps
    # full precision (approx recip would risk the 1e-5 tolerance); the divide is
    # negligible for this HBM-bound kernel either way.
    inv = pl.reciprocal(jnp.sqrt(var) + eps, approx=False)   # (Bb, 1, T)
    y = cen * inv * g_ref[...].astype(jnp.float32) + b_ref[...].astype(jnp.float32)
    o_ref[...] = y.astype(o_ref.dtype)


def prenorm_layernorm(x_nchw, g, b, eps=1e-5):
    """LayerNorm over the channel dim of an NCHW tensor (DDPM PreNorm.norm).

    x_nchw: (B, C, H, W) float32 or bfloat16
    g, b:   (1, C, 1, 1)
    returns (B, C, H, W), dtype of x
    """
    B, C, H, W = x_nchw.shape
    HW = H * W
    x = x_nchw.reshape(B, C, HW)                             # free, contiguous reshape
    dtype = x.dtype
    itemsize = jnp.dtype(dtype).itemsize

    # --- generation-aware VMEM budgeting -----------------------------------
    try:
        vmem_cap = pltpu.get_tpu_info().vmem_capacity_bytes  # 64 MiB v7x, 128 MiB v5e/v6e
    except Exception:
        vmem_cap = 64 * 1024 * 1024                          # conservative (v7x) fallback
    vmem_limit = min((vmem_cap * 3) // 4, 96 * 1024 * 1024)  # 48 MiB v7x, 96 MiB v5e/v6e
    tile_budget = vmem_limit // 6                            # one (Bb, C, t) buffer; 2 in
                                                             # + 2 out double-buffers + slack

    # Physical tile footprint includes sublane padding of the channel axis.
    sublane = 8 if itemsize >= 4 else (16 if itemsize == 2 else 32)
    c_pad = _round_up(C, sublane)
    col_bytes = c_pad * itemsize

    # --- lane (spatial) tile: multiple of 128, as big as the budget allows ---
    t_cap = max(128, (tile_budget // col_bytes) // 128 * 128)
    if t_cap >= HW:
        t = HW                                               # full-dim block: always legal
        n_sp = 1
    else:
        t = t_cap
        n_sp = pl.cdiv(HW, t)                                # ragged last tile handled by Pallas

    # --- batch blocking: amortize per-step overhead for small images ---------
    per_batch_bytes = c_pad * _round_up(t, 128) * itemsize
    bb = min(B, max(1, tile_budget // per_batch_bytes))
    if n_sp == 1 and B > 1:
        bb = min(bb, pl.cdiv(B, 2))                          # keep >= 2 steps for v7x's 2 TCs
    n_bb = pl.cdiv(B, bb)

    g3 = g.reshape(1, C, 1).astype(dtype)
    b3 = b.reshape(1, C, 1).astype(dtype)

    kernel = functools.partial(_prenorm_ln_kernel, eps=eps)
    out = pl.pallas_call(
        kernel,
        out_shape=jax.ShapeDtypeStruct((B, C, HW), dtype),
        grid_spec=pltpu.PrefetchScalarGridSpec(
            num_scalar_prefetch=0,
            grid=(n_bb, n_sp),
            in_specs=[
                pl.BlockSpec((bb, C, t), lambda bi, si: (bi, 0, si)),  # x tile
                pl.BlockSpec((1, C, 1), lambda bi, si: (0, 0, 0)),     # g (resident)
                pl.BlockSpec((1, C, 1), lambda bi, si: (0, 0, 0)),     # b (resident)
            ],
            out_specs=pl.BlockSpec((bb, C, t), lambda bi, si: (bi, 0, si)),
        ),
        compiler_params=pltpu.CompilerParams(
            dimension_semantics=("parallel", "parallel"),
            vmem_limit_bytes=vmem_limit,
        ),
        cost_estimate=pl.CostEstimate(
            flops=8 * B * C * HW,
            transcendentals=2 * B * HW,                       # sqrt + recip per column
            bytes_accessed=2 * B * C * HW * itemsize + 2 * C * 4,
        ),
    )(x, g3, b3)

    return out.reshape(B, C, H, W)


def prenorm_forward(x_nchw, g, b, fn=None, eps=1e-5):
    """PreNorm.forward: fn(LayerNorm(x))."""
    y = prenorm_layernorm(x_nchw, g, b, eps=eps)
    # TODO(synk): PreNorm's `fn` is an arbitrary injected sub-module (e.g.
    # LinearAttention); it is not part of this module's own math, so the demo
    # uses identity. Pass any JAX callable as `fn` to compose.
    return fn(y) if fn is not None else y


if __name__ == "__main__":
    key = jax.random.PRNGKey(0)
    k_x, k_g, k_b = jax.random.split(key, 3)

    B, C, H, W = 2, 4, 16, 16
    x = jax.random.normal(k_x, (B, C, H, W), dtype=jnp.float32)
    # Module init is g=1, b=0; use random values so scale/shift are exercised.
    g = 1.0 + 0.1 * jax.random.normal(k_g, (1, C, 1, 1), dtype=jnp.float32)
    b = 0.1 * jax.random.normal(k_b, (1, C, 1, 1), dtype=jnp.float32)

    y = prenorm_forward(x, g, b)          # fn = identity
    y = jax.block_until_ready(y)

    # Silent correctness check against a pure-JAX reference of the PyTorch math.
    mean = jnp.mean(x, axis=1, keepdims=True)
    var = jnp.mean((x - mean) ** 2, axis=1, keepdims=True)   # unbiased=False
    y_ref = (x - mean) / (jnp.sqrt(var) + 1e-5) * g + b

    assert y.shape == (B, C, H, W)
    np.testing.assert_allclose(np.asarray(y), np.asarray(y_ref), atol=1e-5, rtol=1e-5)

    print("KERNEL_OK")
</pallas_src>

<mosaic_0001>
module attributes {stable_mosaic.version = 11 : i64} {
  func.func @_prenorm_ln_kernel(%arg0: i32, %arg1: i32, %arg2: memref<1x4x256xf32, #tpu.memory_space<vmem>>, %arg3: memref<1x4x1xf32, #tpu.memory_space<vmem>>, %arg4: memref<1x4x1xf32, #tpu.memory_space<vmem>>, %arg5: memref<1x4x256xf32, #tpu.memory_space<vmem>>) attributes {dimension_semantics = [#tpu.dimension_semantics<parallel>, #tpu.dimension_semantics<parallel>], iteration_bounds = array<i64: 2, 1>, scalar_prefetch = 0 : i64, scratch_operands = 0 : i64, tpu.core_type = #tpu.core_type<tc>, window_params = [{transform_indices = @transform_0, window_bounds = array<i64: 1, 4, 256>}, {pipeline_mode = #tpu.pipeline_mode<synchronous>, transform_indices = @transform_1, window_bounds = array<i64: 1, 4, 1>}, {pipeline_mode = #tpu.pipeline_mode<synchronous>, transform_indices = @transform_2, window_bounds = array<i64: 1, 4, 1>}, {transform_indices = @transform_3, window_bounds = array<i64: 1, 4, 256>}]} {
    %c0 = arith.constant 0 : index
    %c0_0 = arith.constant 0 : index
    %c0_1 = arith.constant 0 : index
    %0 = vector.load %arg2[%c0, %c0_0, %c0_1] : memref<1x4x256xf32, #tpu.memory_space<vmem>>, vector<1x4x256xf32>
    %cst = arith.constant dense<0.000000e+00> : vector<1x256xf32>
    %1 = vector.multi_reduction <add>, %0, %cst [1] : vector<1x4x256xf32> to vector<1x256xf32>
    %2 = vector.shape_cast %1 : vector<1x256xf32> to vector<1x1x256xf32>
    %cst_2 = arith.constant 4.000000e+00 : f32
    %3 = vector.broadcast %cst_2 : f32 to vector<1x1x256xf32>
    %4 = arith.divf %2, %3 : vector<1x1x256xf32>
    %5 = vector.broadcast %4 : vector<1x1x256xf32> to vector<1x4x256xf32>
    %6 = arith.subf %0, %5 : vector<1x4x256xf32>
    %7 = arith.mulf %6, %6 : vector<1x4x256xf32>
    %cst_3 = arith.constant dense<0.000000e+00> : vector<1x256xf32>
    %8 = vector.multi_reduction <add>, %7, %cst_3 [1] : vector<1x4x256xf32> to vector<1x256xf32>
    %9 = vector.shape_cast %8 : vector<1x256xf32> to vector<1x1x256xf32>
    %cst_4 = arith.constant 4.000000e+00 : f32
    %10 = vector.broadcast %cst_4 : f32 to vector<1x1x256xf32>
    %11 = arith.divf %9, %10 : vector<1x1x256xf32>
    %12 = math.sqrt %11 : vector<1x1x256xf32>
    %cst_5 = arith.constant 9.99999974E-6 : f32
    %13 = vector.broadcast %cst_5 : f32 to vector<1x1x256xf32>
    %14 = arith.addf %12, %13 : vector<1x1x256xf32>
    %15 = tpu.reciprocal %14 : vector<1x1x256xf32> -> vector<1x1x256xf32>
    %16 = vector.broadcast %15 : vector<1x1x256xf32> to vector<1x4x256xf32>
    %17 = arith.mulf %6, %16 : vector<1x4x256xf32>
    %c0_6 = arith.constant 0 : index
    %c0_7 = arith.constant 0 : index
    %c0_8 = arith.constant 0 : index
    %18 = vector.load %arg3[%c0_6, %c0_7, %c0_8] : memref<1x4x1xf32, #tpu.memory_space<vmem>>, vector<1x4x1xf32>
    %19 = vector.broadcast %18 : vector<1x4x1xf32> to vector<1x4x256xf32>
    %20 = arith.mulf %17, %19 : vector<1x4x256xf32>
    %c0_9 = arith.constant 0 : index
    %c0_10 = arith.constant 0 : index
    %c0_11 = arith.constant 0 : index
    %21 = vector.load %arg4[%c0_9, %c0_10, %c0_11] : memref<1x4x1xf32, #tpu.memory_space<vmem>>, vector<1x4x1xf32>
    %22 = vector.broadcast %21 : vector<1x4x1xf32> to vector<1x4x256xf32>
    %23 = arith.addf %20, %22 : vector<1x4x256xf32>
    %c0_12 = arith.constant 0 : index
    %c0_13 = arith.constant 0 : index
    %c0_14 = arith.constant 0 : index
    %24 = vector.load %arg5[%c0_12, %c0_13, %c0_14] : memref<1x4x256xf32, #tpu.memory_space<vmem>>, vector<1x4x256xf32>
    tpu.vector_store %arg5[%c0_12, %c0_13, %c0_14], %23 {strides = array<i32>} : memref<1x4x256xf32, #tpu.memory_space<vmem>>, vector<1x4x256xf32>,
    return
  }
  func.func @transform_0(%arg0: i32, %arg1: i32) -> (i32, i32, i32) {
    %c0_i32 = arith.constant 0 : i32
    %c0_i32_0 = arith.constant 0 : i32
    return %arg0, %c0_i32, %arg1 : i32, i32, i32
  }
  func.func @transform_1(%arg0: i32, %arg1: i32) -> (i32, i32, i32) {
    %c0_i32 = arith.constant 0 : i32
    %c0_i32_0 = arith.constant 0 : i32
    %c0_i32_1 = arith.constant 0 : i32
    %c0_i32_2 = arith.constant 0 : i32
    return %c0_i32, %c0_i32_0, %c0_i32_1 : i32, i32, i32
  }
  func.func @transform_2(%arg0: i32, %arg1: i32) -> (i32, i32, i32) {
    %c0_i32 = arith.constant 0 : i32
    %c0_i32_0 = arith.constant 0 : i32
    %c0_i32_1 = arith.constant 0 : i32
    %c0_i32_2 = arith.constant 0 : i32
    return %c0_i32, %c0_i32_0, %c0_i32_1 : i32, i32, i32
  }
  func.func @transform_3(%arg0: i32, %arg1: i32) -> (i32, i32, i32) {
    %c0_i32 = arith.constant 0 : i32
    %c0_i32_0 = arith.constant 0 : i32
    return %arg0, %c0_i32, %arg1 : i32, i32, i32
  }
}

</mosaic_0001>

<bundles_post_ra>
// kernel: tpu_custom_call.1
= control target key start
LH: loop header
LB: loop body
LE: loop exit
PB: predicated region body
PF: predicated region fallthrough
CT: control target
= control target key end

     0   :  { %8 = vsyncpa [#allocation3], 0  ;;  %s826_s0 = inlined_call_operand.hbm [shape: f32[2,4,256], index: 0, kind: input, shape index: {}]   ;;  %s827_s1 = inlined_call_operand.vmem [shape: f32[1,4,1], index: 1, kind: input, shape index: {}]   ;;  %s828_s2 = inlined_call_operand.vmem [shape: f32[1,4,1], index: 2, kind: input, shape index: {}]   ;;  %s829_s3 = inlined_call_operand.hbm [shape: f32[2,4,256], index: 3, kind: output, shape index: {}]  }
   0x1   :  { %10 = vsyncpa [#allocation3 + $0x1], 0 }
   0x2   :  { %11 = vsyncpa [#allocation4], 0 }
   0x3   :  { %13 = vsyncpa [#allocation4 + $0x1], 0  ;;  %s685_s12 = smov 0   ;;  %s687_s13 = smov 0  }
   0x4   :  { %s689_s14 = smov 0   ;;  %s691_s15 = smov 0  }
   0x5   :  { %s693_s16 = smov 0   ;;  %s695_s17 = smov 0  }
   0x6 LB: > { %s455_s18 = sadd.s32 4294967295, %s660_s17   ;;  %s456_s19 = sadd.s32 4294967294, %s660_s17   ;;  %s660_s17 = sphi %s695_s17, %s19_s17   ;;  %s656_s16 = sphi %s693_s16, %s838_s16   ;;  %s652_s15 = sphi %s691_s15, %s837_s15   ;;  %s648_s14 = sphi %s689_s14, %s836_s14   ;;  %s644_s13 = sphi %s687_s13, %s835_s13   ;;  %s640_s12 = sphi %s685_s12, %s834_s12  }
   0x7   : > { %s31_s20 = sadd.s32 1, %s656_s16  ;;  %s40_s21 = sadd.s32 1, %s648_s14 }
   0x8   : > { %p33_p0 = scmp.ge.s32.totalorder %s31_s20, 2  ;;  %p47_p1 = scmp.ne.s32.totalorder %s648_s14, %s644_s13 }
   0x9   : > { %p48_p2 = scmp.eq.s32.totalorder %s660_s17, 0  ;;  %p53_p3 = scmp.ne.s32.totalorder %s644_s13, %s640_s12 }
   0xa   : > { %s840_s20 = smov (%p33_p0, %s31_s20), 0  ;;  %p54_p5 = scmp.eq.s32.totalorder %s455_s18, 0 }
   0xb   : > { %p726_p4 = por %p48_p2, %p47_p1  ;;  %s35_s23 = ssub.s32 %s656_s16, %s840_s20 }
   0xc   : > { %p121_p6 = scmp.eq.s32.totalorder %s455_s18, 1  ;;  %p38_p7 = scmp.eq.s32.totalorder %s35_s23, 0 }
   0xd   : > { %p732_p8 = por %p54_p5, %p53_p3  ;;  %p127_p10 = scmp.eq.s32.totalorder %s456_s19, 1 }
   0xe   : > { %p736_p9 = por %p121_p6, %p47_p1  ;;  %p458_p12 = scmp.ge.s32.totalorder %s660_s17, 2 }
   0xf   : > { %s741_s26 = scalar_select %p38_p7, %s648_s14, %s40_s21  }
  0x10   : > { %p743_p11 = por %p127_p10, %p53_p3  ;;  %p484_p13 = scmp.lt.s32.totalorder %s660_s17, 2 }
  0x11   : > { %s153_s28 = sand.u32 1, %s648_s14   ;;  %s470_s30 = sshll.u32 %s656_s16, 3 }
  0x12   : > { %s459_s29 = sshll.u32 %s153_s28, 3  ;;  %s164_s6 = scalar_lea.hbm %s826_s0, %s470_s30 }
  0x13   : > { %s157_s7 = scalar_lea.vmem [#allocation2], %s459_s29  ;;  %s166_s9 = sshll.u32 %s164_s6, 4  ;;  %s167_s9 = int_to_ptr.hbm [resolvable:$true] %s166_s9 }
  0x14   : > { %s168_s8 = sshll.u32 %s157_s7, 4  ;;  %p477_p0 = pnand %p484_p13, %p726_p4  ;;  %s169_s8 = int_to_ptr.vmem [resolvable:$true] %s168_s8 }
  0x15   : > { %p462_p1 = scmp.ge.s32.totalorder %s660_s17, 1  ;;  %p173_p2 = scmp.lt.s32.totalorder %s660_s17, 3 }
  0x16   : > { %s154_s10 = scalar_lea.sflag [#allocation3], %s153_s28 }
  0x17   : > { %479 = dma.hbm_to_vmem [thread:$0]  (!%p477_p0), %s167_s9, 128, %s169_s8, %s154_s10  }
  0x18   : > { %p174_p3 = pnand %p462_p1, %p173_p2 }
  0x19   : > { %s759_s11 = sand.u32 (!%p174_p3), 1, %s644_s13  }
  0x1a   : > { %177 = sbr.rel (%p174_p3) target bundleno = 164 (0xa4), region = 32  ;;  %s463_s18 = sshll.u32 (!%p174_p3), %s759_s11, 3 }
  0x1b   : > { %s180_s19 = scalar_lea.sflag (!%p174_p3), [#allocation3], %s759_s11  ;;  %s183_s21 = scalar_lea.vmem (!%p174_p3), [#allocation2], %s463_s18 }
  0x1f   : > { %631 = dma.done.wait (%p732_p8), %s180_s19, 128  }
  0x20   : > { %633 = vsyncadd (%p732_p8), %s180_s19, 4294967168  ;;  %v662_v0 = vmov 0   ;;  %v663_v1 = vmov 4.0   ;;  %v329_v3 = vld [vmem:[%s827_s1] sm:$0xf]  ;;  %v209_v4 = vld [vmem:[%s183_s21] sm:$0xff] }
  0x21   : > { %537 = vset.pattern.permute.xlu0 %v662_v0  ;;  %538 = vrcp.f32 %v663_v1  ;;  %211 = vst [vmem:[#allocation1] ss:$2 sm:$0xff] %v209_v4  ;;  %v340_v6 = vld [vmem:[%s828_s2] sm:$0xf]  ;;  %vm216_vm0 = vcmask 1043456   ;;  %s471_s24 = sshll.u32 %s652_s15, 3 }
  0x22   : > { %332 = vperm.xlu0 %537, %v329_v3   ;;  %s366_s5 = scalar_lea.hbm %s829_s3, %s471_s24  ;;  %s206_s6 = scalar_lea.vmem [#allocation5], %s463_s18 }
  0x23   : > { %s368_s7 = sshll.u32 %s206_s6, 4  ;;  %s370_s8 = sshll.u32 %s366_s5, 4  ;;  %s369_s7 = int_to_ptr.vmem [resolvable:$true] %s368_s7  ;;  %s371_s8 = int_to_ptr.hbm [resolvable:$true] %s370_s8 }
  0x24   : > { %s353_s15 = scalar_lea.sflag [#allocation4], %s759_s11  ;;  %s592_s9 = sshra.s32 %s371_s8, 4  ;;  %s593_s9 = int_to_ptr.hbm [resolvable:$true] %s592_s9 }
  0x25   : > { %s594_s10 = scalar_lea.hbm %s593_s9, 8  ;;  %s598_s18 = scalar_lea.hbm %s829_s3, 16 }
  0x26   : > { %p595_p4 = scmp.ne.s32.totalorder %s593_s9, %s594_s10  ;;  %p599_p7 = scmp.lt.s32.totalorder %s593_s9, %s829_s3 }
  0x27   : > { %v539_v2 = vpop.eup %538  ;;  %p600_p8 = scmp.lt.s32.totalorder %s598_s18, %s594_s10 }
  0x28   : > { %v232_v5 = vmul.f32 4.0, %v539_v2  ;;  %v212_v8 = vld.sshfl [vmem:[#allocation1] sm:$0xff pattern:$0x75316420]  ;;  %vm236_vm1 = vweird.f32 %v539_v2  ;;  %p596_p5 = pnand %p595_p4, %p736_p9 }
  0x29   : > { %v213_v9 = vld.sshfl [vmem:[#allocation1 + $0x8] sm:$0xff pattern:$0x75316420]  ;;  %v217_v10 = vsel %vm216_vm0, %v212_v8, 0.0  ;;  %p601_p10 = por %p600_p8, %p599_p7 }
  0x2a   : > { %v233_v7 = vsub.f32 1.0, %v232_v5  ;;  %343 = vperm.xlu0 %537, %v340_v6   ;;  %v224_v11 = vsel %vm216_vm0, %v213_v9, 0.0  ;;  %v218_v12 = vrot.slane %v217_v10, 4  ;;  %p597_p6 = pneg %p596_p5 }
  0x2b   : > { %v225_v13 = vrot.slane %v224_v11, 4 }
  0x2c   : > { %v234_v14 = vmul.f32 %v539_v2, %v233_v7  ;;  %v219_v15 = vadd.f32 %v218_v12, %v217_v10  ;;  %p602_p13 = pnand %p601_p10, %p597_p6 }
  0x2d   : > { %v226_v16 = vadd.f32 %v225_v13, %v224_v11 }
  0x2e   : > { %v220_v17 = vrot.slane %v219_v15, 2  ;;  %v235_v19 = vadd.f32 %v539_v2, %v234_v14 }
  0x2f   : > { %v227_v18 = vrot.slane %v226_v16, 2 }
  0x30   : > { %v221_v20 = vadd.f32 %v220_v17, %v219_v15  ;;  %v237_v24 = vsel %vm236_vm1, %v539_v2, %v235_v19 }
  0x31   : > { %v228_v21 = vadd.f32 %v227_v18, %v226_v16 }
  0x32   : > { %v222_v22 = vrot.slane %v221_v20, 1 }
  0x33   : > { %v229_v23 = vrot.slane %v228_v21, 1 }
  0x34   : > { %v223_v25 = vadd.f32 %v222_v22, %v221_v20 }
  0x35   : > { %v230_v26 = vadd.f32 %v229_v23, %v228_v21 }
  0x36   : > { %v238_v27 = vmul.f32 %v237_v24, %v223_v25 }
  0x37   : > { %v239_v28 = vmul.f32 %v237_v24, %v230_v26 }
  0x39   : > { %v242_v29 = vrot.slane %v239_v28, 4  ;;  %v664_v28 = vmov 839922192  }
  0x3b   : > { %v243_v30 = vsel %vm216_vm0, %v238_v27, %v242_v29  ;;  %v335_v29 = vunpack.c.l.s4 %v664_v28 }
  0x3c   : > { %v778_v31 = vsub.f32 %v209_v4, %v243_v30 }
  0x3e   : > { %v246_v32 = vmul.f32 %v778_v31, %v778_v31 }
  0x40   : > { %248 = vst [vmem:[#allocation1] ss:$2 sm:$0xff] %v246_v32 }
  0x47   : > { %v249_v33 = vld.sshfl [vmem:[#allocation1] sm:$0xff pattern:$0x75316420]  ;;  %v250_v34 = vld.sshfl [vmem:[#allocation1 + $0x8] sm:$0xff pattern:$0x75316420] }
  0x48   : > { %v253_v35 = vsel %vm216_vm0, %v249_v33, 0.0  ;;  %v260_v36 = vsel %vm216_vm0, %v250_v34, 0.0  ;;  %v336_v34 = vunpack.c.0.s8 %v335_v29 }
  0x49   : > { %v254_v37 = vrot.slane %v253_v35, 4  ;;  %v261_v38 = vrot.slane %v260_v36, 4 }
  0x4b   : > { %v255_v39 = vadd.f32 %v254_v37, %v253_v35  ;;  %v262_v40 = vadd.f32 %v261_v38, %v260_v36 }
  0x4d   : > { %v256_v41 = vrot.slane %v255_v39, 2  ;;  %v263_v42 = vrot.slane %v262_v40, 2 }
  0x4f   : > { %v257_v43 = vadd.f32 %v256_v41, %v255_v39  ;;  %v264_v44 = vadd.f32 %v263_v42, %v262_v40 }
  0x51   : > { %v258_v45 = vrot.slane %v257_v43, 1  ;;  %v265_v46 = vrot.slane %v264_v44, 1 }
  0x53   : > { %v259_v47 = vadd.f32 %v258_v45, %v257_v43  ;;  %v266_v48 = vadd.f32 %v265_v46, %v264_v44 }
  0x55   : > { %v267_v49 = vmul.f32 %v259_v47, %v237_v24  ;;  %v268_v50 = vmul.f32 %v266_v48, %v237_v24 }
  0x57   : > { %540 = vrsqrt.f32 %v267_v49  ;;  %vm288_vm2 = vcmp.eq.f32.partialorder %v268_v50, inf  ;;  %v291_v63 = vand.u32 2147483648, %v268_v50  ;;  %vm290_vm3 = vcmp.eq.f32.partialorder %v268_v50, 0.0 }
  0x58   : > { %542 = vrsqrt.f32 %v268_v50  ;;  %vm276_vm4 = vcmp.eq.f32.partialorder %v267_v49, inf  ;;  %v279_v3 = vand.u32 2147483648, %v267_v49  ;;  %vm278_vm5 = vcmp.eq.f32.partialorder %v267_v49, 0.0 }
  0x5d   : > { %v541_v51 = vpop.eup %540 }
  0x5e   : > { %v543_v52 = vpop.eup %542  ;;  %v270_v53 = vmul.f32 %v541_v51, %v267_v49 }
  0x5f   : > { %v282_v54 = vmul.f32 %v543_v52, %v268_v50 }
  0x60   : > { %v271_v55 = vmul.f32 %v541_v51, %v270_v53 }
  0x61   : > { %v283_v56 = vmul.f32 %v543_v52, %v282_v54 }
  0x62   : > { %v272_v57 = vmul.f32 0.5, %v271_v55 }
  0x63   : > { %v284_v58 = vmul.f32 0.5, %v283_v56 }
  0x64   : > { %v273_v59 = vsub.f32 1.5, %v272_v57 }
  0x65   : > { %v285_v60 = vsub.f32 1.5, %v284_v58 }
  0x66   : > { %v274_v61 = vmul.f32 %v541_v51, %v273_v59 }
  0x67   : > { %v286_v62 = vmul.f32 %v543_v52, %v285_v60 }
  0x68   : > { %v275_v0 = vmul.f32 %v274_v61, %v267_v49 }
  0x69   : > { %v287_v1 = vmul.f32 %v286_v62, %v268_v50 }
  0x6a   : > { %v277_v5 = vsel %vm276_vm4, %v267_v49, %v275_v0 }
  0x6b   : > { %v289_v2 = vsel %vm288_vm2, %v268_v50, %v287_v1  ;;  %v280_v7 = vsel %vm278_vm5, %v279_v3, %v277_v5 }
  0x6c   : > { %v292_v4 = vsel %vm290_vm3, %v291_v63, %v289_v2  ;;  %v293_v8 = vadd.f32 1e-05, %v280_v7 }
  0x6d   : > { %v294_v6 = vadd.f32 1e-05, %v292_v4 }
  0x6e   : > { %vm300_vm9 = vweird.f32 %v293_v8  ;;  %v306_v20 = vand.u32 2147483648, %v293_v8  ;;  %v304_v23 = vand.u32 2147483647, %v293_v8 }
  0x6f   : > { %544 = vrcp.f32 %v294_v6  ;;  %vm314_vm6 = vweird.f32 %v294_v6  ;;  %v320_v16 = vand.u32 2147483648, %v294_v6  ;;  %v318_v19 = vand.u32 2147483647, %v294_v6 }
  0x70   : > { %546 = vrcp.f32 %v293_v8  ;;  %v307_v25 = vor.u32 1.1754944e-38, %v306_v20  ;;  %vm305_vm13 = vcmp.eq.f32.partialorder %v304_v23, 8.507059e+37 }
  0x71   : > { %v321_v21 = vor.u32 1.1754944e-38, %v320_v16  ;;  %vm319_vm11 = vcmp.eq.f32.partialorder %v318_v19, 8.507059e+37 }
  0x75   : > { %v545_v9 = vpop.eup %544 }
  0x76   : > { %v310_v10 = vmul.f32 %v545_v9, %v294_v6  ;;  %v547_v11 = vpop.eup %546  ;;  %vm315_vm7 = vweird.f32 %v545_v9 }
  0x77   : > { %v296_v12 = vmul.f32 %v547_v11, %v293_v8  ;;  %vm316_vm8 = vmor %vm314_vm6, %vm315_vm7  ;;  %vm301_vm10 = vweird.f32 %v547_v11 }
  0x78   : > { %v311_v13 = vsub.f32 1.0, %v310_v10  ;;  %vm302_vm12 = vmor %vm300_vm9, %vm301_vm10 }
  0x79   : > { %v297_v14 = vsub.f32 1.0, %v296_v12 }
  0x7a   : > { %v312_v15 = vmul.f32 %v545_v9, %v311_v13 }
  0x7b   : > { %v298_v17 = vmul.f32 %v547_v11, %v297_v14 }
  0x7c   : > { %v313_v18 = vadd.f32 %v545_v9, %v312_v15 }
  0x7d   : > { %v299_v22 = vadd.f32 %v547_v11, %v298_v17 }
  0x7e   : > { %v317_v24 = vsel %vm316_vm8, %v545_v9, %v313_v18 }
  0x7f   : > { %v322_v26 = vsel %vm319_vm11, %v321_v21, %v317_v24  ;;  %v303_v27 = vsel %vm302_vm12, %v547_v11, %v299_v22 }
  0x80   : > { %v325_v30 = vrot.slane %v322_v26, 4  ;;  %v308_v32 = vsel %vm305_vm13, %v307_v25, %v303_v27 }
  0x82   : > { %v326_v35 = vsel %vm216_vm0, %v308_v32, %v325_v30 }
  0x83   : > { %v328_v36 = vmul.f32 %v326_v35, %v778_v31 }
  0x94   : > { %v333_v33 = vpop.permute.xlu0 %332 }
  0x95   : > { %v337_v37 = vperm.slane %v333_v33, %v336_v34 }
  0x97   : > { %v339_v39 = vmul.f32 %v337_v37, %v328_v36 }
  0x9c   : > { %v344_v38 = vpop.permute.xlu0 %343 }
  0x9d   : > { %v348_v40 = vperm.slane %v344_v38, %v336_v34 }
  0x9f   : > { %v350_v41 = vadd.f32 %v348_v40, %v339_v39 }
  0xa1   : > { %351 = vst [vmem:[%s206_s6] sm:$0xff] %v350_v41 }
  0xa2   : > { %605 = shalt.err (!%p602_p13)
}
  0xa3   : > { %474 = dma.vmem_to_hbm [thread:$0]  (%p736_p9), %s369_s7, 128, %s371_s8, %s353_s15  }
  0xa4 PF: > { %s382_s11 = sand.u32 1, %s640_s12   ;;  %p481_p0 = pnand %p458_p12, %p743_p11 }
  0xa5   : > { %s383_s28 = scalar_lea.sflag [#allocation4], %s382_s11 }
  0xa6   : > { %p482_p1 = pneg %p481_p0 }
  0xa8   : > { %635 = dma.done.wait (%p482_p1), %s383_s28, 128  }
  0xa9   : > { %637 = vsyncadd (%p482_p1), %s383_s28, 4294967168  ;;  %s19_s17 = sadd.s32 1, %s660_s17   ;;  %s834_s12 = smov %s644_s13 }
  0xaa   : > { %p16_p2 = scmp.ge.s32.totalorder %s19_s17, 4   ;;  %s835_s13 = smov %s648_s14 }
  0xab   : > { %s836_s14 = smov %s741_s26  ;;  %s837_s15 = smov %s656_s16 }
  0xac   : > { %s838_s16 = smov %s840_s20  ;;  %18 = sbr.rel (!%p16_p2) target bundleno = 6 (0x6), region = 77 }
  0xb1   :  { %389 = vsyncpa [#allocation3], 1 }
  0xb2   :  { %391 = vsyncpa [#allocation3 + $0x1], 1 }
  0xb3   :  { %392 = vsyncpa [#allocation4], 1 }
  0xb4   :  { %394 = vsyncpa [#allocation4 + $0x1], 1 }

</bundles_post_ra>
